<compile_context>
chip_gen: v5e
topology: v5e:2x2
jax: 0.10.0
libtpu: 0.0.40
codegen_flags: <defaults>
</compile_context>

<pallas_src>
import functools

import jax
import jax.numpy as jnp
import numpy as np
from jax.experimental import pallas as pl
from jax.experimental.pallas import tpu as pltpu


def _symbolic_kan_kernel(params_ref, x_ref, xT_ref,
                         outT_ref, l1_ref, min_ref, max_ref,
                         *, inv_batch):
    step = pl.program_id(0)
    last = pl.num_programs(0) - 1

    alpha = params_ref[0]                     # (O, I)   folded: c*a
    beta = params_ref[1]                      # (O, I)   folded: c*b + d
    x = x_ref[...]                            # (TB, I)  natural layout (min/max only)
    xT = xT_ref[...]                          # (I, TB)  batch on the lane axis

    # ---- output tile on the MXU: out[j, n] = sum_i alpha[j,i]*x[n,i] + sum_i beta[j,i]
    beta_sum = jnp.sum(beta, axis=1, keepdims=True)                       # (O, 1), tiny
    outT_ref[...] = (jnp.dot(alpha, xT, preferred_element_type=jnp.float32)
                     + beta_sum)                                          # (O, TB)

    # ---- init resident accumulators (their BlockSpec index is constant over the grid)
    @pl.when(step == 0)
    def _():
        l1_ref[...] = jnp.zeros_like(l1_ref)
        min_ref[...] = jnp.full_like(min_ref, jnp.inf)
        max_ref[...] = jnp.full_like(max_ref, -jnp.inf)

    # ---- post-activations with batch on lanes: (O, I, TB); only |.| is needed.
    acts = alpha[:, :, None] * xT[None, :, :] + beta[:, :, None]
    l1_ref[...] += jnp.sum(jnp.abs(acts), axis=-1)                        # (O, I)

    # ---- running column min/max of x
    min_ref[...] = jnp.minimum(min_ref[...], jnp.min(x, axis=0, keepdims=True))
    max_ref[...] = jnp.maximum(max_ref[...], jnp.max(x, axis=0, keepdims=True))

    # ---- finalize: mean over batch, normalize by the global per-column range
    @pl.when(step == last)
    def _():
        # reciprocal of one (1, I) row on the EUP instead of O(O*I) VPU divides
        inv_range = pl.reciprocal(max_ref[...] - min_ref[...], approx=True)   # (1, I)
        l1_ref[...] = l1_ref[...] * (inv_batch * inv_range)


def symbolic_kan_forward(x, affine, *, batch_tile=128):
    """x: (batch, in_features) f32; affine: (out_features, in_features, 4) f32.

    Returns (output, l1_norm, min_vals, max_vals): the value the PyTorch forward
    returns plus the attributes it stores on self.
    """
    B, I = x.shape
    O = affine.shape[0]

    # Fold the affine constants once (O(O*I) host/XLA work vs O(B*O*I) kernel savings)
    # and ship them as a single contiguous (2, O, I) tensor.
    a, b, c, d = affine[..., 0], affine[..., 1], affine[..., 2], affine[..., 3]
    alpha = c * a
    beta = c * b + d
    params = jnp.stack([alpha, beta])                     # (2, O, I)

    xT = jnp.transpose(x)                                 # (I, B): batch -> lane axis

    TB = batch_tile if (B % batch_tile == 0) else B
    grid = (B // TB,)

    kernel = functools.partial(_symbolic_kan_kernel, inv_batch=1.0 / B)

    outT, l1, mn, mx = pl.pallas_call(
        kernel,
        out_shape=(
            jax.ShapeDtypeStruct((O, B), jnp.float32),    # output (transposed, lane-dense)
            jax.ShapeDtypeStruct((O, I), jnp.float32),    # l1_norm
            jax.ShapeDtypeStruct((1, I), jnp.float32),    # min_vals
            jax.ShapeDtypeStruct((1, I), jnp.float32),    # max_vals
        ),
        grid_spec=pltpu.PrefetchScalarGridSpec(
            num_scalar_prefetch=0,
            grid=grid,
            in_specs=[
                pl.BlockSpec((2, O, I), lambda bstep: (0, 0, 0)),   # params, resident
                pl.BlockSpec((TB, I), lambda bstep: (bstep, 0)),    # x tile
                pl.BlockSpec((I, TB), lambda bstep: (0, bstep)),    # xT tile
            ],
            out_specs=(
                pl.BlockSpec((O, TB), lambda bstep: (0, bstep)),    # per-tile output
                pl.BlockSpec((O, I), lambda bstep: (0, 0)),         # resident accumulators
                pl.BlockSpec((1, I), lambda bstep: (0, 0)),
                pl.BlockSpec((1, I), lambda bstep: (0, 0)),
            ),
        ),
        compiler_params=pltpu.CompilerParams(
            # batch is a reduction axis for l1/min/max -> must be "arbitrary".
            dimension_semantics=("arbitrary",),
            # Explicit VMEM budget; tile sizing here stays far under v7x's 64 MiB/TC.
            vmem_limit_bytes=32 * 1024 * 1024,
        ),
    )(params, x, xT)

    return jnp.transpose(outT), l1, mn[0], mx[0]


if __name__ == "__main__":
    key = jax.random.PRNGKey(0)
    B, IN, OUT = 256, 8, 16       # small; B chosen so the grid has 2 batch tiles of 128
    kx, ka = jax.random.split(key)

    x = jax.random.normal(kx, (B, IN), dtype=jnp.float32)
    # Module __init__ zero-inits affine (which would make everything 0); use deterministic
    # random values of the same shape so the kernel does non-trivial work.
    affine = jax.random.normal(ka, (OUT, IN, 4), dtype=jnp.float32)

    out, l1, mn, mx = symbolic_kan_forward(x, affine)
    jax.block_until_ready(out)

    # Pure-JAX reference of the PyTorch forward semantics (un-folded formula).
    a, b, c, d = affine[..., 0], affine[..., 1], affine[..., 2], affine[..., 3]
    acts_expected = c[None] * (a[None] * x[:, None, :] + b[None]) + d[None]
    out_expected = acts_expected.sum(axis=2)
    mn_expected = x.min(axis=0)
    mx_expected = x.max(axis=0)
    l1_expected = jnp.mean(jnp.abs(acts_expected), axis=0) / (mx_expected - mn_expected)

    np.testing.assert_allclose(np.asarray(out), np.asarray(out_expected), rtol=1e-5, atol=1e-5)
    np.testing.assert_allclose(np.asarray(mn), np.asarray(mn_expected), rtol=1e-6, atol=1e-6)
    np.testing.assert_allclose(np.asarray(mx), np.asarray(mx_expected), rtol=1e-6, atol=1e-6)
    # l1 uses the EUP approximate reciprocal + folded affine constants -> looser tolerance.
    np.testing.assert_allclose(np.asarray(l1), np.asarray(l1_expected), rtol=1e-2, atol=1e-5)

    print("KERNEL_OK")
</pallas_src>

<mosaic_0001>
module attributes {stable_mosaic.version = 11 : i64} {
  func.func @_symbolic_kan_kernel(%arg0: i32, %arg1: memref<2x16x8xf32, #tpu.memory_space<vmem>>, %arg2: memref<128x8xf32, #tpu.memory_space<vmem>>, %arg3: memref<8x128xf32, #tpu.memory_space<vmem>>, %arg4: memref<16x128xf32, #tpu.memory_space<vmem>>, %arg5: memref<16x8xf32, #tpu.memory_space<vmem>>, %arg6: memref<1x8xf32, #tpu.memory_space<vmem>>, %arg7: memref<1x8xf32, #tpu.memory_space<vmem>>) attributes {dimension_semantics = [#tpu.dimension_semantics<arbitrary>], iteration_bounds = array<i64: 2>, scalar_prefetch = 0 : i64, scratch_operands = 0 : i64, tpu.core_type = #tpu.core_type<tc>, window_params = [{pipeline_mode = #tpu.pipeline_mode<synchronous>, transform_indices = @transform_0, window_bounds = array<i64: 2, 16, 8>}, {transform_indices = @transform_1, window_bounds = array<i64: 128, 8>}, {transform_indices = @transform_2, window_bounds = array<i64: 8, 128>}, {transform_indices = @transform_3, window_bounds = array<i64: 16, 128>}, {pipeline_mode = #tpu.pipeline_mode<synchronous>, transform_indices = @transform_4, window_bounds = array<i64: 16, 8>}, {pipeline_mode = #tpu.pipeline_mode<synchronous>, transform_indices = @transform_5, window_bounds = array<i64: 1, 8>}, {pipeline_mode = #tpu.pipeline_mode<synchronous>, transform_indices = @transform_6, window_bounds = array<i64: 1, 8>}]} {
    %c0 = arith.constant 0 : index
    %c0_0 = arith.constant 0 : index
    %c0_1 = arith.constant 0 : index
    %0 = vector.load %arg1[%c0, %c0_0, %c0_1] : memref<2x16x8xf32, #tpu.memory_space<vmem>>, vector<1x16x8xf32>
    %1 = vector.shape_cast %0 : vector<1x16x8xf32> to vector<16x8xf32>
    %c1 = arith.constant 1 : index
    %c0_2 = arith.constant 0 : index
    %c0_3 = arith.constant 0 : index
    %2 = vector.load %arg1[%c1, %c0_2, %c0_3] : memref<2x16x8xf32, #tpu.memory_space<vmem>>, vector<1x16x8xf32>
    %3 = vector.shape_cast %2 : vector<1x16x8xf32> to vector<16x8xf32>
    %c0_4 = arith.constant 0 : index
    %c0_5 = arith.constant 0 : index
    %4 = vector.load %arg2[%c0_4, %c0_5] : memref<128x8xf32, #tpu.memory_space<vmem>>, vector<128x8xf32>
    %c0_6 = arith.constant 0 : index
    %c0_7 = arith.constant 0 : index
    %5 = vector.load %arg3[%c0_6, %c0_7] : memref<8x128xf32, #tpu.memory_space<vmem>>, vector<8x128xf32>
    %cst = arith.constant dense<0.000000e+00> : vector<16xf32>
    %6 = vector.multi_reduction <add>, %3, %cst [1] : vector<16x8xf32> to vector<16xf32>
    %7 = vector.shape_cast %6 : vector<16xf32> to vector<16x1xf32>
    %cst_8 = arith.constant dense<0.000000e+00> : vector<16x128xf32>
    %8 = tpu.matmul %1, %5, %cst_8 {dimension_numbers = #tpu.dot_dimension_numbers<[1], [0], [0], [1], [0, 0, 1, 1], [], []>} : vector<16x8xf32>, vector<8x128xf32>, vector<16x128xf32> -> vector<16x128xf32>
    %9 = vector.broadcast %7 : vector<16x1xf32> to vector<16x128xf32>
    %10 = arith.addf %8, %9 : vector<16x128xf32>
    %c0_9 = arith.constant 0 : index
    %c0_10 = arith.constant 0 : index
    %11 = vector.load %arg4[%c0_9, %c0_10] : memref<16x128xf32, #tpu.memory_space<vmem>>, vector<16x128xf32>
    tpu.vector_store %arg4[%c0_9, %c0_10], %10 {strides = array<i32>} : memref<16x128xf32, #tpu.memory_space<vmem>>, vector<16x128xf32>,
    %c0_i32 = arith.constant 0 : i32
    %12 = arith.cmpi eq, %arg0, %c0_i32 : i32
    %13 = arith.extui %12 : i1 to i32
    %c0_i32_11 = arith.constant 0 : i32
    %14 = arith.cmpi ne, %13, %c0_i32_11 : i32
    scf.if %14 {
      %cst_28 = arith.constant 0.000000e+00 : f32
      %41 = vector.broadcast %cst_28 : f32 to vector<16x8xf32>
      %c0_29 = arith.constant 0 : index
      %c0_30 = arith.constant 0 : index
      %42 = vector.load %arg5[%c0_29, %c0_30] : memref<16x8xf32, #tpu.memory_space<vmem>>, vector<16x8xf32>
      tpu.vector_store %arg5[%c0_29, %c0_30], %41 {strides = array<i32>} : memref<16x8xf32, #tpu.memory_space<vmem>>, vector<16x8xf32>,
      %cst_31 = arith.constant 0x7F800000 : f32
      %43 = vector.broadcast %cst_31 : f32 to vector<1x8xf32>
      %c0_32 = arith.constant 0 : index
      %c0_33 = arith.constant 0 : index
      %44 = vector.load %arg6[%c0_32, %c0_33] : memref<1x8xf32, #tpu.memory_space<vmem>>, vector<1x8xf32>
      tpu.vector_store %arg6[%c0_32, %c0_33], %43 {strides = array<i32>} : memref<1x8xf32, #tpu.memory_space<vmem>>, vector<1x8xf32>,
      %cst_34 = arith.constant 0xFF800000 : f32
      %45 = vector.broadcast %cst_34 : f32 to vector<1x8xf32>
      %c0_35 = arith.constant 0 : index
      %c0_36 = arith.constant 0 : index
      %46 = vector.load %arg7[%c0_35, %c0_36] : memref<1x8xf32, #tpu.memory_space<vmem>>, vector<1x8xf32>
      tpu.vector_store %arg7[%c0_35, %c0_36], %45 {strides = array<i32>} : memref<1x8xf32, #tpu.memory_space<vmem>>, vector<1x8xf32>,
    } else {
    }
    %15 = vector.shape_cast %1 : vector<16x8xf32> to vector<16x8x1xf32>
    %16 = vector.shape_cast %5 : vector<8x128xf32> to vector<1x8x128xf32>
    %17 = vector.broadcast %15 : vector<16x8x1xf32> to vector<16x8x128xf32>
    %18 = vector.broadcast %16 : vector<1x8x128xf32> to vector<16x8x128xf32>
    %19 = arith.mulf %17, %18 : vector<16x8x128xf32>
    %20 = vector.shape_cast %3 : vector<16x8xf32> to vector<16x8x1xf32>
    %21 = vector.broadcast %20 : vector<16x8x1xf32> to vector<16x8x128xf32>
    %22 = arith.addf %19, %21 : vector<16x8x128xf32>
    %c0_12 = arith.constant 0 : index
    %c0_13 = arith.constant 0 : index
    %23 = vector.load %arg5[%c0_12, %c0_13] : memref<16x8xf32, #tpu.memory_space<vmem>>, vector<16x8xf32>
    %24 = math.absf %22 : vector<16x8x128xf32>
    %cst_14 = arith.constant dense<0.000000e+00> : vector<16x8xf32>
    %25 = vector.multi_reduction <add>, %24, %cst_14 [2] : vector<16x8x128xf32> to vector<16x8xf32>
    %26 = arith.addf %23, %25 : vector<16x8xf32>
    %c0_15 = arith.constant 0 : index
    %c0_16 = arith.constant 0 : index
    %27 = vector.load %arg5[%c0_15, %c0_16] : memref<16x8xf32, #tpu.memory_space<vmem>>, vector<16x8xf32>
    tpu.vector_store %arg5[%c0_15, %c0_16], %26 {strides = array<i32>} : memref<16x8xf32, #tpu.memory_space<vmem>>, vector<16x8xf32>,
    %c0_17 = arith.constant 0 : index
    %c0_18 = arith.constant 0 : index
    %28 = vector.load %arg6[%c0_17, %c0_18] : memref<1x8xf32, #tpu.memory_space<vmem>>, vector<1x8xf32>
    %cst_19 = arith.constant dense<0x7F800000> : vector<8xf32>
    %29 = vector.multi_reduction <minimumf>, %4, %cst_19 [0] : vector<128x8xf32> to vector<8xf32>
    %30 = vector.shape_cast %29 : vector<8xf32> to vector<1x8xf32>
    %31 = arith.minimumf %28, %30 : vector<1x8xf32>
    %c0_20 = arith.constant 0 : index
    %c0_21 = arith.constant 0 : index
    %32 = vector.load %arg6[%c0_20, %c0_21] : memref<1x8xf32, #tpu.memory_space<vmem>>, vector<1x8xf32>
    tpu.vector_store %arg6[%c0_20, %c0_21], %31 {strides = array<i32>} : memref<1x8xf32, #tpu.memory_space<vmem>>, vector<1x8xf32>,
    %c0_22 = arith.constant 0 : index
    %c0_23 = arith.constant 0 : index
    %33 = vector.load %arg7[%c0_22, %c0_23] : memref<1x8xf32, #tpu.memory_space<vmem>>, vector<1x8xf32>
    %cst_24 = arith.constant dense<0xFF800000> : vector<8xf32>
    %34 = vector.multi_reduction <maximumf>, %4, %cst_24 [0] : vector<128x8xf32> to vector<8xf32>
    %35 = vector.shape_cast %34 : vector<8xf32> to vector<1x8xf32>
    %36 = arith.maximumf %33, %35 : vector<1x8xf32>
    %c0_25 = arith.constant 0 : index
    %c0_26 = arith.constant 0 : index
    %37 = vector.load %arg7[%c0_25, %c0_26] : memref<1x8xf32, #tpu.memory_space<vmem>>, vector<1x8xf32>
    tpu.vector_store %arg7[%c0_25, %c0_26], %36 {strides = array<i32>} : memref<1x8xf32, #tpu.memory_space<vmem>>, vector<1x8xf32>,
    %c1_i32 = arith.constant 1 : i32
    %38 = arith.cmpi eq, %arg0, %c1_i32 : i32
    %39 = arith.extui %38 : i1 to i32
    %c0_i32_27 = arith.constant 0 : i32
    %40 = arith.cmpi ne, %39, %c0_i32_27 : i32
    scf.if %40 {
      %c0_28 = arith.constant 0 : index
      %c0_29 = arith.constant 0 : index
      %41 = vector.load %arg7[%c0_28, %c0_29] : memref<1x8xf32, #tpu.memory_space<vmem>>, vector<1x8xf32>
      %c0_30 = arith.constant 0 : index
      %c0_31 = arith.constant 0 : index
      %42 = vector.load %arg6[%c0_30, %c0_31] : memref<1x8xf32, #tpu.memory_space<vmem>>, vector<1x8xf32>
      %43 = arith.subf %41, %42 : vector<1x8xf32>
      %44 = tpu.reciprocal %43 {approx = true} : vector<1x8xf32> -> vector<1x8xf32>
      %c0_32 = arith.constant 0 : index
      %c0_33 = arith.constant 0 : index
      %45 = vector.load %arg5[%c0_32, %c0_33] : memref<16x8xf32, #tpu.memory_space<vmem>>, vector<16x8xf32>
      %cst_34 = arith.constant 3.906250e-03 : f32
      %46 = vector.broadcast %cst_34 : f32 to vector<1x8xf32>
      %47 = arith.mulf %46, %44 : vector<1x8xf32>
      %48 = vector.broadcast %47 : vector<1x8xf32> to vector<16x8xf32>
      %49 = arith.mulf %45, %48 : vector<16x8xf32>
      %c0_35 = arith.constant 0 : index
      %c0_36 = arith.constant 0 : index
      %50 = vector.load %arg5[%c0_35, %c0_36] : memref<16x8xf32, #tpu.memory_space<vmem>>, vector<16x8xf32>
      tpu.vector_store %arg5[%c0_35, %c0_36], %49 {strides = array<i32>} : memref<16x8xf32, #tpu.memory_space<vmem>>, vector<16x8xf32>,
    } else {
    }
    return
  }
  func.func @transform_0(%arg0: i32) -> (i32, i32, i32) {
    %c0_i32 = arith.constant 0 : i32
    %c0_i32_0 = arith.constant 0 : i32
    %c0_i32_1 = arith.constant 0 : i32
    %c0_i32_2 = arith.constant 0 : i32
    return %c0_i32, %c0_i32_0, %c0_i32_1 : i32, i32, i32
  }
  func.func @transform_1(%arg0: i32) -> (i32, i32) {
    %c0_i32 = arith.constant 0 : i32
    %c0_i32_0 = arith.constant 0 : i32
    return %arg0, %c0_i32 : i32, i32
  }
  func.func @transform_2(%arg0: i32) -> (i32, i32) {
    %c0_i32 = arith.constant 0 : i32
    %c0_i32_0 = arith.constant 0 : i32
    return %c0_i32, %arg0 : i32, i32
  }
  func.func @transform_3(%arg0: i32) -> (i32, i32) {
    %c0_i32 = arith.constant 0 : i32
    %c0_i32_0 = arith.constant 0 : i32
    return %c0_i32, %arg0 : i32, i32
  }
  func.func @transform_4(%arg0: i32) -> (i32, i32) {
    %c0_i32 = arith.constant 0 : i32
    %c0_i32_0 = arith.constant 0 : i32
    %c0_i32_1 = arith.constant 0 : i32
    return %c0_i32, %c0_i32_0 : i32, i32
  }
  func.func @transform_5(%arg0: i32) -> (i32, i32) {
    %c0_i32 = arith.constant 0 : i32
    %c0_i32_0 = arith.constant 0 : i32
    %c0_i32_1 = arith.constant 0 : i32
    return %c0_i32, %c0_i32_0 : i32, i32
  }
  func.func @transform_6(%arg0: i32) -> (i32, i32) {
    %c0_i32 = arith.constant 0 : i32
    %c0_i32_0 = arith.constant 0 : i32
    %c0_i32_1 = arith.constant 0 : i32
    return %c0_i32, %c0_i32_0 : i32, i32
  }
}

</mosaic_0001>

<bundles_post_ra>
// kernel: tpu_custom_call.1
= control target key start
LH: loop header
LB: loop body
LE: loop exit
PB: predicated region body
PF: predicated region fallthrough
CT: control target
= control target key end

     0   :  { %s1560_s0 = inlined_call_operand.vmem [shape: f32[2,16,8], index: 0, kind: input, shape index: {}]   ;;  %s1561_s1 = inlined_call_operand.vmem [shape: f32[256,8], index: 1, kind: input, shape index: {}]   ;;  %s1562_s2 = inlined_call_operand.vmem [shape: f32[8,256], index: 2, kind: input, shape index: {}]   ;;  %s1563_s3 = inlined_call_operand.hbm [shape: f32[16,256], index: 3, kind: output, shape index: {0}]   ;;  %s1564_s4 = inlined_call_operand.vmem [shape: f32[16,8], index: 4, kind: output, shape index: {1}]   ;;  %s1565_s5 = inlined_call_operand.hbm [shape: f32[1,8], index: 5, kind: output, shape index: {2}]   ;;  %s1566_s6 = inlined_call_operand.hbm [shape: f32[1,8], index: 6, kind: output, shape index: {3}]  }
   0x1   :  { %1567 = sst [smem:[#allocation9_spill]] %s1560_s0 }
   0x2   :  { %12 = vsyncpa [#allocation3], 0 }
   0x3   :  { %14 = vsyncpa [#allocation3 + $0x1], 0 }
   0x4   :  { %15 = vsyncpa [#allocation5], 0  ;;  %s1193_s21 = smov 0   ;;  %s1195_s22 = smov 0  }
   0x5   :  { %s1197_s23 = smov 0   ;;  %s1199_s24 = smov 0  }
   0x6 LB: > { %s1214_s25 = sadd.s32 4294967295, %s1148_s24   ;;  %s939_s26 = sadd.s32 4294967294, %s1148_s24   ;;  %s1148_s24 = sphi %s1199_s24, %s1574_s24   ;;  %s1144_s23 = sphi %s1197_s23, %s1573_s23   ;;  %s1140_s22 = sphi %s1195_s22, %s1572_s22   ;;  %s1136_s21 = sphi %s1193_s21, %s1571_s21  }
   0x7   : > { %s1218_s27 = sadd.s32 1, %s1148_s24   ;;  %s101_s28 = sadd.s32 1, %s1144_s23 }
   0x8   : > { %s98_s29 = ssub.s32 %s1148_s24, %s1218_s27  ;;  %p111_p0 = scmp.ne.s32.totalorder %s1144_s23, %s1140_s22 }
   0x9   : > { %p99_p1 = scmp.eq.s32.totalorder %s98_s29, 0  ;;  %p112_p2 = scmp.eq.s32.totalorder %s1214_s25, 1 }
   0xa   : > { %p117_p3 = scmp.ne.s32.totalorder %s1140_s22, %s1136_s21  ;;  %p118_p4 = scmp.eq.s32.totalorder %s939_s26, 1 }
   0xb   : > { %s1229_s30 = scalar_select %p99_p1, %s1144_s23, %s101_s28  }
   0xc   : > { %p1233_p5 = por %p112_p2, %p111_p0  ;;  %p1237_p6 = por %p118_p4, %p117_p3 }
   0xd   : > { %p942_p7 = scmp.ge.s32.totalorder %s1148_s24, 1  ;;  %p218_p8 = scmp.lt.s32.totalorder %s1148_s24, 3 }
   0xf   : > { %p219_p9 = pnand %p942_p7, %p218_p8 }
  0x10   : > { %s944_s9 = sshll.u32 (!%p219_p9), %s1214_s25, 4  ;;  %p258_p10 = scmp.lt.s32.totalorder (!%p219_p9), %s1214_s25, 1 }
  0x11   : > { %222 = sbr.rel (%p219_p9) target bundleno = 554 (0x22a), region = 32  ;;  %s1570_s0 = sld [smem:[#allocation9_spill]] (!%p219_p9) }
  0x12   : > { %p253_p11 = scmp.lt.s32.totalorder (!%p219_p9), %s944_s9, 31  ;;  %p951_p12 = scmp.ne.s32.totalorder (!%p219_p9), %s1214_s25, 0 }
  0x16   : > { %vm284_vm0 = vcmask 64512   ;;  %s259_s12 = scalar_select %p258_p10, %s1214_s25, 1 }
  0x17   : > { %v1248_v0 = vld [vmem:[%s1570_s0 + $0x10] sm:$0xff]  ;;  %s1576_s9 = smov (!%p253_p11, %s944_s9), 31  ;;  %v1256_v2 = vld [vmem:[%s1570_s0 + $0x18] sm:$0xff]  ;;  %v1264_v3 = vld [vmem:[%s1570_s0] sm:$0xff] }
  0x18   : > { %v285_v1 = vsel %vm284_vm0, %v1248_v0, 0.0  ;;  %s946_s13 = sshll.u32 %s259_s12, 3  ;;  %s945_s16 = sshll.u32 %s1576_s9, 3  ;;  %v1269_v4 = vld [vmem:[%s1570_s0 + $0x8] sm:$0xff]  ;;  %v288_v9 = vsel %vm284_vm0, %v1256_v2, 0.0 }
  0x19   : > { %286 = vadd.xlane.f32.xlu0 %v285_v1  ;;  %s261_s19 = scalar_lea.vmem %s1562_s2, %s946_s13  ;;  %s256_s12 = scalar_lea.vmem %s1561_s1, %s945_s16 }
  0x1a   : > { %v1274_v5 = vld [vmem:[%s261_s19] sm:$0xff]  ;;  %v1278_v7 = vld [vmem:[%s256_s12 + $0x8] sm:$0xff]  ;;  %v1280_v8 = vld [vmem:[%s256_s12 + $0x10] sm:$0xff]  ;;  %s243_s9 = sand.u32 1, %s1140_s22  }
  0x1b   : > { %v1276_v6 = vld [vmem:[%s256_s12] sm:$0xff]  ;;  %312 = vmatpush.msra.mxu0 %v1274_v5  ;;  %961 = vmatpush.msra.mxu1 %v1274_v5  ;;  %v1286_v10 = vld [vmem:[%s256_s12 + $0x18] sm:$0xff]  ;;  %v1290_v12 = vld [vmem:[%s256_s12 + $0x28] sm:$0xff]  ;;  %s943_s13 = sshll.u32 %s243_s9, 4 }
  0x1c   : > { %v1288_v11 = vld [vmem:[%s256_s12 + $0x20] sm:$0xff]  ;;  %949 = vmatmul.msk.f32.vlgmr.msra.gmra.mxu0 %vm284_vm0, %v1264_v3  ;;  %950 = vmatmul.msk.f32.vlgmr.msra.gmra.mxu1 %vm284_vm0, %v1269_v4  ;;  %v1296_v13 = vld [vmem:[%s256_s12 + $0x30] sm:$0xff]  ;;  %v1298_v14 = vld [vmem:[%s256_s12 + $0x38] sm:$0xff]  ;;  %s1319_s14 = scalar_lea.vmem [#allocation2], %s943_s13 }
  0x1d   : > { %v1300_v15 = vld [vmem:[%s256_s12 + $0x40] sm:$0xff]  ;;  %v1302_v16 = vld [vmem:[%s256_s12 + $0x48] sm:$0xff]  ;;  %v1304_v17 = vld [vmem:[%s256_s12 + $0x50] sm:$0xff] }
  0x1e   : > { %v1306_v18 = vld [vmem:[%s256_s12 + $0x58] sm:$0xff]  ;;  %v1308_v19 = vld [vmem:[%s256_s12 + $0x60] sm:$0xff]  ;;  %v1310_v20 = vld [vmem:[%s256_s12 + $0x68] sm:$0xff] }
  0x1f   : > { %v1312_v21 = vld [vmem:[%s256_s12 + $0x70] sm:$0xff]  ;;  %v1314_v22 = vld [vmem:[%s256_s12 + $0x78] sm:$0xff] }
  0x21   : > { %289 = vadd.xlane.f32.xlu0 %v288_v9 }
  0x8c   : > { %v287_v23 = vpop.xlane.xlu0 %286 }
  0x94   : > { %v290_v24 = vpop.xlane.xlu0 %289 }
  0x99   : > { %v314_v25 = vpop.f32.mrf.mxu0  ;;  %v317_v26 = vpop.f32.mrf.mxu1  ;;  %325 = sbr.rel (%p951_p12) target bundleno = 163 (0xa3), region = 36 }
  0x9a   : > { %v315_v27 = vadd.f32 %v314_v25, %v287_v23  ;;  %v318_v28 = vadd.f32 %v317_v26, %v290_v24 }
  0x9c   : > { %320 = vst [vmem:[%s1319_s14] sm:$0xff] %v315_v27 }
  0x9d   : > { %321 = vst [vmem:[%s1319_s14 + $0x8] sm:$0xff] %v318_v28 }
  0x9e   : > { %vm328_vm1 = vcmask 57344   ;;  %v1150_v29 = vmov 0.0   ;;  %v1151_v30 = vmov inf   ;;  %v1152_v31 = vmov -inf  }
  0x9f   : > { %326 = vst.msk [vmem:[%s1564_s4] sm:$0xff] %vm284_vm0, %v1150_v29 }
  0xa0   : > { %327 = vst.msk [vmem:[%s1564_s4 + $0x8] sm:$0xff] %vm284_vm0, %v1150_v29 }
  0xa1   : > { %329 = vst.msk [vmem:[#allocation4] sm:$0x1] %vm328_vm1, %v1151_v30 }
  0xa2   : > { %330 = vst.msk [vmem:[#allocation6] sm:$0x1] %vm328_vm1, %v1152_v31 }
  0xa3 PF: > { %v332_v32 = vlaneseq  ;;  %v359_v34 = vperm.slane %v1264_v3, 4  ;;  %v345_v35 = vperm.slane %v1264_v3, 2  ;;  %v331_v36 = vperm.slane %v1264_v3, 0  ;;  %p952_p13 = scmp.ne.s32.totalorder %s1214_s25, 1 }
  0xa4   : > { %v366_v37 = vperm.slane %v1264_v3, 5  ;;  %v352_v38 = vperm.slane %v1264_v3, 3  ;;  %v338_v39 = vperm.slane %v1264_v3, 1  ;;  %v387_v40 = vperm.slane %v1269_v4, 0 }
  0xa5   : > { %v333_v33 = vshrl.u32 %v332_v32, 7  ;;  %v380_v41 = vperm.slane %v1264_v3, 7  ;;  %v373_v42 = vperm.slane %v1264_v3, 6  ;;  %v408_v43 = vperm.slane %v1269_v4, 3 }
  0xa6   : > { %v401_v44 = vperm.slane %v1269_v4, 2  ;;  %v394_v45 = vperm.slane %v1269_v4, 1  ;;  %v429_v46 = vperm.slane %v1269_v4, 6  ;;  %v422_v47 = vperm.slane %v1269_v4, 5 }
  0xa7   : > { %1023 = vset.pattern.permute.xlu2 %v333_v33  ;;  %1022 = vset.pattern.permute.xlu1 %v333_v33  ;;  %v415_v48 = vperm.slane %v1269_v4, 4  ;;  %v466_v49 = vperm.slane %v1248_v0, 1  ;;  %v459_v50 = vperm.slane %v1248_v0, 0  ;;  %v436_v51 = vperm.slane %v1269_v4, 7 }
  0xa8   : > { %1021 = vset.pattern.permute.xlu0 %v333_v33  ;;  %v487_v52 = vperm.slane %v1248_v0, 4  ;;  %v480_v53 = vperm.slane %v1248_v0, 3  ;;  %v473_v54 = vperm.slane %v1248_v0, 2  ;;  %v508_v55 = vperm.slane %v1248_v0, 7 }
  0xa9   : > { %v501_v56 = vperm.slane %v1248_v0, 6  ;;  %v494_v57 = vperm.slane %v1248_v0, 5  ;;  %v529_v58 = vperm.slane %v1256_v2, 2  ;;  %v522_v59 = vperm.slane %v1256_v2, 1 }
  0xaa   : > { %v515_v60 = vperm.slane %v1256_v2, 0  ;;  %v550_v61 = vperm.slane %v1256_v2, 5  ;;  %v543_v62 = vperm.slane %v1256_v2, 4  ;;  %v536_v63 = vperm.slane %v1256_v2, 3 }
  0xab   : > { %v564_v0 = vperm.slane %v1256_v2, 7  ;;  %v557_v1 = vperm.slane %v1256_v2, 6  ;;  %vm737_vm2 = vcmask 57344   ;;  %vm671_vm3 = vcmask 1041409  }
  0xac   : > { %vm673_vm4 = vcmask 1042434   ;;  %vm675_vm5 = vcmask 1043459   ;;  %vm677_vm6 = vcmask 1044484   ;;  %vm681_vm7 = vcmask 1046534  }
  0xad   : > { %vm679_vm8 = vcmask 1045509   ;;  %vm683_vm9 = vcmask 1047559  }
  0xaf   : > { %364 = vperm.xlu2 %1023, %v359_v34   ;;  %350 = vperm.xlu1 %1022, %v345_v35  }
  0xb0   : > { %336 = vperm.xlu0 %1021, %v331_v36  }
  0xb7   : > { %371 = vperm.xlu2 %1023, %v366_v37   ;;  %357 = vperm.xlu1 %1022, %v352_v38  }
  0xb8   : > { %343 = vperm.xlu0 %1021, %v338_v39  }
  0xbf   : > { %392 = vperm.xlu2 %1023, %v387_v40   ;;  %385 = vperm.xlu1 %1022, %v380_v41  }
  0xc0   : > { %378 = vperm.xlu0 %1021, %v373_v42  }
  0xc7   : > { %413 = vperm.xlu2 %1023, %v408_v43   ;;  %406 = vperm.xlu1 %1022, %v401_v44  }
  0xc8   : > { %399 = vperm.xlu0 %1021, %v394_v45  }
  0xcf   : > { %434 = vperm.xlu2 %1023, %v429_v46   ;;  %427 = vperm.xlu1 %1022, %v422_v47  }
  0xd0   : > { %420 = vperm.xlu0 %1021, %v415_v48  }
  0xd7   : > { %471 = vperm.xlu2 %1023, %v466_v49   ;;  %464 = vperm.xlu1 %1022, %v459_v50  }
  0xd8   : > { %441 = vperm.xlu0 %1021, %v436_v51  }
  0xdf   : > { %492 = vperm.xlu2 %1023, %v487_v52   ;;  %485 = vperm.xlu1 %1022, %v480_v53  }
  0xe0   : > { %478 = vperm.xlu0 %1021, %v473_v54  }
  0xe7   : > { %513 = vperm.xlu2 %1023, %v508_v55   ;;  %506 = vperm.xlu1 %1022, %v501_v56  }
  0xe8   : > { %499 = vperm.xlu0 %1021, %v494_v57  }
  0xef   : > { %534 = vperm.xlu2 %1023, %v529_v58   ;;  %527 = vperm.xlu1 %1022, %v522_v59  }
  0xf0   : > { %520 = vperm.xlu0 %1021, %v515_v60  }
  0xf7   : > { %555 = vperm.xlu2 %1023, %v550_v61   ;;  %548 = vperm.xlu1 %1022, %v543_v62  }
  0xf8   : > { %541 = vperm.xlu0 %1021, %v536_v63  }
  0xff   : > { %569 = vperm.xlu1 %1022, %v564_v0  }
 0x100   : > { %562 = vperm.xlu0 %1021, %v557_v1  }
 0x109   : > { %v365_v3 = vpop.permute.xlu2 %364 }
 0x10a   : > { %v447_v50 = vmul.f32 %v365_v3, %v1274_v5 }
 0x111   : > { %v1365_v4 = vpop.permute.xlu2 %371 }
 0x119   : > { %v393_v9 = vpop.permute.xlu2 %392 }
 0x11a   : > { %v451_v0 = vmul.f32 %v393_v9, %v1274_v5 }
 0x121   : > { %v1367_v23 = vpop.permute.xlu2 %413  ;;  %v351_v24 = vpop.permute.xlu1 %350 }
 0x122   : > { %v337_v25 = vpop.permute.xlu0 %336  ;;  %v454_v9 = vmul.f32 %v1367_v23, %v1274_v5 }
 0x123   : > { %v443_v41 = vmul.f32 %v337_v25, %v1274_v5 }
 0x129   : > { %v1369_v26 = vpop.permute.xlu2 %434  ;;  %v358_v27 = vpop.permute.xlu1 %357 }
 0x12a   : > { %v344_v28 = vpop.permute.xlu0 %343 }
 0x12b   : > { %v444_v29 = vmul.f32 %v344_v28, %v1274_v5 }
 0x131   : > { %v472_v30 = vpop.permute.xlu2 %471  ;;  %v386_v31 = vpop.permute.xlu1 %385 }
 0x132   : > { %v572_v33 = vadd.f32 %v472_v30, %v444_v29  ;;  %v1372_v2 = vpop.permute.xlu0 %378  ;;  %v450_v61 = vmul.f32 %v386_v31, %v1274_v5 }
 0x134   : > { %v590_v34 = vand.u32 2147483647, %v572_v33 }
 0x136   : > { %607 = vadd.xlane.f32.xlu0 %v590_v34  ;;  %v445_v34 = vmul.f32 %v351_v24, %v1274_v5 }
 0x139   : > { %v493_v35 = vpop.permute.xlu2 %492  ;;  %v407_v36 = vpop.permute.xlu1 %406 }
 0x13a   : > { %v400_v37 = vpop.permute.xlu0 %399  ;;  %v453_v42 = vmul.f32 %v407_v36, %v1274_v5  ;;  %v575_v51 = vadd.f32 %v493_v35, %v447_v50  ;;  %v446_v35 = vmul.f32 %v358_v27, %v1274_v5  ;;  %v448_v27 = vmul.f32 %v1365_v4, %v1274_v5 }
 0x13b   : > { %v452_v62 = vmul.f32 %v400_v37, %v1274_v5 }
 0x13c   : > { %v593_v54 = vand.u32 2147483647, %v575_v51 }
 0x141   : > { %v514_v38 = vpop.permute.xlu2 %513  ;;  %v428_v39 = vpop.permute.xlu1 %427 }
 0x142   : > { %v421_v40 = vpop.permute.xlu0 %420  ;;  %v456_v56 = vmul.f32 %v428_v39, %v1274_v5  ;;  %v578_v63 = vadd.f32 %v514_v38, %v450_v61 }
 0x144   : > { %v596_v29 = vand.u32 2147483647, %v578_v63 }
 0x149   : > { %v535_v43 = vpop.permute.xlu2 %534  ;;  %v465_v44 = vpop.permute.xlu1 %464 }
 0x14a   : > { %v581_v45 = vadd.f32 %v535_v43, %v453_v42  ;;  %v571_v46 = vadd.f32 %v465_v44, %v443_v41  ;;  %v442_v47 = vpop.permute.xlu0 %441  ;;  %v455_v42 = vmul.f32 %v421_v40, %v1274_v5  ;;  %v457_v40 = vmul.f32 %v1369_v26, %v1274_v5 }
 0x14b   : > { %v701_v26 = vsel %vm284_vm0, %v1280_v8, inf }
 0x14c   : > { %v599_v48 = vand.u32 2147483647, %v581_v45  ;;  %v589_v49 = vand.u32 2147483647, %v571_v46  ;;  %v449_v46 = vmul.f32 %v1372_v2, %v1274_v5  ;;  %v699_v2 = vsel %vm284_vm0, %v1276_v6, inf }
 0x14e   : > { %605 = vadd.xlane.f32.xlu2 %v589_v49  ;;  %625 = vadd.xlane.f32.xlu0 %v599_v48 }
 0x151   : > { %v486_v52 = vpop.permute.xlu1 %485  ;;  %v556_v55 = vpop.permute.xlu2 %555 }
 0x152   : > { %v479_v53 = vpop.permute.xlu0 %478  ;;  %v584_v57 = vadd.f32 %v556_v55, %v456_v56  ;;  %v574_v36 = vadd.f32 %v486_v52, %v446_v35 }
 0x153   : > { %v573_v31 = vadd.f32 %v479_v53, %v445_v34  ;;  %v458_v53 = vmul.f32 %v442_v47, %v1274_v5  ;;  %v703_v5 = vsel %vm284_vm0, %v1288_v11, inf  ;;  %v705_v47 = vsel %vm284_vm0, %v1290_v12, inf }
 0x154   : > { %v602_v60 = vand.u32 2147483647, %v584_v57  ;;  %v592_v38 = vand.u32 2147483647, %v574_v36  ;;  %v700_v57 = vsel %vm284_vm0, %v1278_v7, inf  ;;  %v704_v61 = vmin.f32 %v699_v2, %v703_v5 }
 0x155   : > { %v591_v37 = vand.u32 2147483647, %v573_v31  ;;  %v717_v34 = vsel %vm284_vm0, %v1306_v18, inf  ;;  %v719_v31 = vsel %vm284_vm0, %v1308_v19, inf  ;;  %v721_v36 = vsel %vm284_vm0, %v1310_v20, inf }
 0x156   : > { %613 = vadd.xlane.f32.xlu0 %v593_v54 }
 0x159   : > { %v507_v58 = vpop.permute.xlu1 %506 }
 0x15a   : > { %v500_v59 = vpop.permute.xlu0 %499  ;;  %v577_v49 = vadd.f32 %v507_v58, %v449_v46  ;;  %v702_v58 = vsel %vm284_vm0, %v1286_v10, inf  ;;  %v744_v46 = vsel %vm284_vm0, %v1288_v11, -inf  ;;  %v752_v11 = vsel %vm284_vm0, %v1300_v15, -inf }
 0x15b   : > { %v576_v48 = vadd.f32 %v500_v59, %v448_v27  ;;  %v707_v59 = vsel %vm284_vm0, %v1296_v13, inf  ;;  %v743_v27 = vsel %vm284_vm0, %v1286_v10, -inf }
 0x15c   : > { %v595_v50 = vand.u32 2147483647, %v577_v49  ;;  %v708_v63 = vmin.f32 %v701_v26, %v707_v59 }
 0x15d   : > { %v594_v23 = vand.u32 2147483647, %v576_v48 }
 0x15e   : > { %631 = vadd.xlane.f32.xlu0 %v602_v60  ;;  %v709_v60 = vsel %vm284_vm0, %v1298_v14, inf }
 0x161   : > { %v528_v1 = vpop.permute.xlu1 %527 }
 0x162   : > { %v580_v3 = vadd.f32 %v528_v1, %v452_v62  ;;  %v521_v25 = vpop.permute.xlu0 %520  ;;  %v706_v62 = vmin.f32 %v700_v57, %v705_v47  ;;  %v710_v1 = vmin.f32 %v702_v58, %v709_v60 }
 0x163   : > { %v579_v28 = vadd.f32 %v521_v25, %v451_v0  ;;  %v713_v25 = vsel %vm284_vm0, %v1302_v16, inf }
 0x164   : > { %v598_v30 = vand.u32 2147483647, %v580_v3  ;;  %v711_v3 = vsel %vm284_vm0, %v1300_v15, inf  ;;  %v718_v35 = vmin.f32 %v710_v1, %v717_v34  ;;  %v762_v15 = vsel %vm284_vm0, %v1310_v20, -inf }
 0x165   : > { %v597_v33 = vand.u32 2147483647, %v579_v28  ;;  %v715_v28 = vsel %vm284_vm0, %v1304_v17, inf }
 0x166   : > { %619 = vadd.xlane.f32.xlu0 %v596_v29  ;;  %623 = vadd.xlane.f32.xlu2 %v598_v30  ;;  %v712_v29 = vmin.f32 %v704_v61, %v711_v3  ;;  %v714_v30 = vmin.f32 %v706_v62, %v713_v25  ;;  %v698_v25 = vld [vmem:[#allocation4] sm:$0x1] }
 0x167   : > { %621 = vadd.xlane.f32.xlu1 %v597_v33  ;;  %v716_v33 = vmin.f32 %v708_v63, %v715_v28 }
 0x169   : > { %v549_v41 = vpop.permute.xlu1 %548 }
 0x16a   : > { %v542_v39 = vpop.permute.xlu0 %541  ;;  %v583_v24 = vadd.f32 %v549_v41, %v455_v42  ;;  %v725_v41 = vsel %vm284_vm0, %v1314_v22, inf  ;;  %v740_v42 = vsel %vm284_vm0, %v1276_v6, -inf  ;;  %v746_v6 = vsel %vm284_vm0, %v1290_v12, -inf }
 0x16b   : > { %v582_v43 = vadd.f32 %v542_v39, %v454_v9  ;;  %v722_v39 = vmin.f32 %v714_v30, %v721_v36  ;;  %v745_v49 = vmax.f32 %v740_v42, %v744_v46  ;;  %v754_v12 = vsel %vm284_vm0, %v1302_v16, -inf }
 0x16c   : > { %v601_v45 = vand.u32 2147483647, %v583_v24  ;;  %v742_v24 = vsel %vm284_vm0, %v1280_v8, -inf  ;;  %v750_v8 = vsel %vm284_vm0, %v1298_v14, -inf  ;;  %v758_v14 = vsel %vm284_vm0, %v1306_v18, -inf }
 0x16d   : > { %v600_v44 = vand.u32 2147483647, %v582_v43  ;;  %v741_v43 = vsel %vm284_vm0, %v1278_v7, -inf  ;;  %v748_v7 = vsel %vm284_vm0, %v1296_v13, -inf  ;;  %v751_v10 = vmax.f32 %v743_v27, %v750_v8 }
 0x16e   : > { %609 = vadd.xlane.f32.xlu2 %v591_v37  ;;  %v723_v37 = vsel %vm284_vm0, %v1312_v21, inf  ;;  %v756_v13 = vsel %vm284_vm0, %v1304_v17, -inf  ;;  %v764_v16 = vsel %vm284_vm0, %v1312_v21, -inf  ;;  %v766_v17 = vsel %vm284_vm0, %v1314_v22, -inf }
 0x16f   : > { %611 = vadd.xlane.f32.xlu1 %v592_v38  ;;  %v720_v38 = vmin.f32 %v712_v29, %v719_v31  ;;  %v724_v9 = vmin.f32 %v716_v33, %v723_v37  ;;  %v759_v2 = vmax.f32 %v751_v10, %v758_v14  ;;  %v739_v37 = vld [vmem:[#allocation6] sm:$0x1] }
 0x171   : > { %v570_v52 = vpop.permute.xlu1 %569  ;;  %v767_v47 = vmax.f32 %v759_v2, %v766_v17  ;;  %v588_v17 = vld [vmem:[%s1564_s4 + $0x8] sm:$0xff] }
 0x172   : > { %v563_v51 = vpop.permute.xlu0 %562  ;;  %v586_v4 = vadd.f32 %v570_v52, %v458_v53  ;;  %v753_v53 = vmax.f32 %v745_v49, %v752_v11 }
 0x173   : > { %v585_v54 = vadd.f32 %v563_v51, %v457_v40  ;;  %v749_v51 = vmax.f32 %v742_v24, %v748_v7 }
 0x174   : > { %v604_v56 = vand.u32 2147483647, %v586_v4 }
 0x175   : > { %v603_v55 = vand.u32 2147483647, %v585_v54  ;;  %v757_v4 = vmax.f32 %v749_v51, %v756_v13  ;;  %v587_v13 = vld [vmem:[%s1564_s4] sm:$0xff] }
 0x176   : > { %627 = vadd.xlane.f32.xlu2 %v600_v44  ;;  %v726_v44 = vmin.f32 %v718_v35, %v725_v41  ;;  %v654_v35 = vand.u32 127, %v332_v32 }
 0x177   : > { %629 = vadd.xlane.f32.xlu1 %v601_v45  ;;  %v727_v45 = vmin.f32 %v720_v38, %v722_v39  ;;  %v765_v5 = vmax.f32 %v757_v4, %v764_v16 }
 0x179   : > { %v769_v61 = vmax.f32 %v765_v5, %v767_v47 }
 0x17e   : > { %615 = vadd.xlane.f32.xlu2 %v594_v23  ;;  %v728_v23 = vmin.f32 %v724_v9, %v726_v44 }
 0x17f   : > { %617 = vadd.xlane.f32.xlu1 %v595_v50  ;;  %v747_v50 = vmax.f32 %v741_v43, %v746_v6 }
 0x180   : > { %v729_v52 = vmin.f32 %v727_v45, %v728_v23 }
 0x181   : > { %v755_v54 = vmax.f32 %v747_v50, %v754_v12 }
 0x183   : > { %v763_v26 = vmax.f32 %v755_v54, %v762_v15 }
 0x186   : > { %633 = vadd.xlane.f32.xlu2 %v603_v55  ;;  %v760_v55 = vsel %vm284_vm0, %v1308_v19, -inf }
 0x187   : > { %635 = vadd.xlane.f32.xlu1 %v604_v56  ;;  %v730_v56 = vrot.slane %v729_v52, 4  ;;  %v761_v57 = vmax.f32 %v753_v53, %v760_v55 }
 0x189   : > { %v731_v58 = vmin.f32 %v729_v52, %v730_v56  ;;  %v768_v59 = vmax.f32 %v761_v57, %v763_v26 }
 0x18b   : > { %v732_v19 = vrot.slane %v731_v58, 2  ;;  %v770_v63 = vmax.f32 %v768_v59, %v769_v61 }
 0x18d   : > { %v733_v62 = vmin.f32 %v731_v58, %v732_v19  ;;  %v771_v20 = vrot.slane %v770_v63, 4 }
 0x18f   : > { %v734_v3 = vrot.slane %v733_v62, 1  ;;  %v772_v29 = vmax.f32 %v770_v63, %v771_v20 }
 0x191   : > { %v735_v28 = vmin.f32 %v733_v62, %v734_v3  ;;  %v773_v33 = vrot.slane %v772_v29, 2 }
 0x193   : > { %v736_v22 = vmin.f32 %v698_v25, %v735_v28  ;;  %v774_v34 = vmax.f32 %v772_v29, %v773_v33 }
 0x195   : > { %738 = vst.msk [vmem:[#allocation4] sm:$0x1] %vm737_vm2, %v736_v22  ;;  %v775_v31 = vrot.slane %v774_v34, 1 }
 0x197   : > { %v776_v39 = vmax.f32 %v774_v34, %v775_v31 }
 0x199   : > { %v777_v24 = vmax.f32 %v739_v37, %v776_v39 }
 0x19b   : > { %778 = vst.msk [vmem:[#allocation6] sm:$0x1] %vm737_vm2, %v777_v24 }
 0x1a9   : > { %v1409_v0 = vpop.xlane.xlu0 %607 }
 0x1aa   : > { %v656_v42 = vperm.slane %v1409_v0, %v654_v35 }
 0x1c1   : > { %v1437_v48 = vpop.xlane.xlu2 %605  ;;  %v1445_v40 = vpop.xlane.xlu0 %625 }
 0x1c2   : > { %v655_v38 = vperm.slane %v1437_v48, %v654_v35  ;;  %v665_v23 = vperm.slane %v1445_v40, %v654_v35 }
 0x1c4   : > { %v672_v44 = vsel %vm671_vm3, %v656_v42, %v655_v38 }
 0x1c9   : > { %v614_v1 = vpop.xlane.xlu0 %613 }
 0x1ca   : > { %v659_v49 = vperm.slane %v614_v1, %v654_v35 }
 0x1d1   : > { %v632_v36 = vpop.xlane.xlu0 %631 }
 0x1d2   : > { %v668_v2 = vperm.slane %v632_v36, %v654_v35 }
 0x1d9   : > { %v624_v18 = vpop.xlane.xlu2 %623  ;;  %v620_v0 = vpop.xlane.xlu0 %619 }
 0x1da   : > { %v622_v60 = vpop.xlane.xlu1 %621  ;;  %v664_v32 = vperm.slane %v624_v18, %v654_v35  ;;  %v662_v52 = vperm.slane %v620_v0, %v654_v35 }
 0x1db   : > { %v663_v27 = vperm.slane %v622_v60, %v654_v35 }
 0x1dd   : > { %v685_v6 = vsel %vm671_vm3, %v664_v32, %v663_v27 }
 0x1de   : > { %v686_v12 = vsel %vm673_vm4, %v665_v23, %v685_v6 }
 0x1e1   : > { %v610_v21 = vpop.xlane.xlu2 %609 }
 0x1e2   : > { %v612_v30 = vpop.xlane.xlu1 %611  ;;  %v657_v9 = vperm.slane %v610_v21, %v654_v35 }
 0x1e3   : > { %v658_v45 = vperm.slane %v612_v30, %v654_v35 }
 0x1e4   : > { %v674_v46 = vsel %vm673_vm4, %v657_v9, %v672_v44 }
 0x1e5   : > { %v676_v48 = vsel %vm675_vm5, %v658_v45, %v674_v46 }
 0x1e6   : > { %v678_v11 = vsel %vm677_vm6, %v659_v49, %v676_v48 }
 0x1e9   : > { %v628_v41 = vpop.xlane.xlu2 %627 }
 0x1ea   : > { %v630_v43 = vpop.xlane.xlu1 %629  ;;  %v666_v7 = vperm.slane %v628_v41, %v654_v35 }
 0x1eb   : > { %v667_v53 = vperm.slane %v630_v43, %v654_v35 }
 0x1ec   : > { %v687_v40 = vsel %vm675_vm5, %v666_v7, %v686_v12 }
 0x1ed   : > { %v688_v56 = vsel %vm677_vm6, %v667_v53, %v687_v40 }
 0x1ee   : > { %v689_v58 = vsel %vm679_vm8, %v668_v2, %v688_v56 }
 0x1f1   : > { %v616_v8 = vpop.xlane.xlu2 %615 }
 0x1f2   : > { %v618_v50 = vpop.xlane.xlu1 %617  ;;  %v660_v51 = vperm.slane %v616_v8, %v654_v35 }
 0x1f3   : > { %v661_v10 = vperm.slane %v618_v50, %v654_v35 }
 0x1f4   : > { %v680_v54 = vsel %vm679_vm8, %v660_v51, %v678_v11 }
 0x1f5   : > { %v682_v4 = vsel %vm681_vm7, %v661_v10, %v680_v54 }
 0x1f6   : > { %v684_v14 = vsel %vm683_vm9, %v662_v52, %v682_v4 }
 0x1f7   : > { %v694_v55 = vadd.f32 %v684_v14, %v587_v13 }
 0x1f9   : > { %696 = vst.msk [vmem:[%s1564_s4] sm:$0xff] %vm284_vm0, %v694_v55  ;;  %v634_v57 = vpop.xlane.xlu2 %633 }
 0x1fa   : > { %v636_v15 = vpop.xlane.xlu1 %635  ;;  %v669_v26 = vperm.slane %v634_v57, %v654_v35 }
 0x1fb   : > { %v670_v16 = vperm.slane %v636_v15, %v654_v35 }
 0x1fc   : > { %v690_v5 = vsel %vm681_vm7, %v669_v26, %v689_v58  ;;  %782 = sbr.rel (%p952_p13) target bundleno = 531 (0x213), region = 40 }
 0x1fd   : > { %v691_v47 = vsel %vm683_vm9, %v670_v16, %v690_v5 }
 0x1fe   : > { %v695_v18 = vadd.f32 %v691_v47, %v588_v17 }
 0x200   : > { %697 = vst.msk [vmem:[%s1564_s4 + $0x8] sm:$0xff] %vm284_vm0, %v695_v18 }
 0x201   : > { %v783_v59 = vld [vmem:[#allocation6] sm:$0x1]  ;;  %v784_v60 = vld [vmem:[#allocation4] sm:$0x1] }
 0x202   : > { %v785_v19 = vsub.f32 %v783_v59, %v784_v60  ;;  %v787_v63 = vld [vmem:[%s1564_s4] sm:$0xff] }
 0x204   : > { %1024 = vrcp.f32 %v785_v19 }
 0x207   : > { %v788_v1 = vld [vmem:[%s1564_s4 + $0x8] sm:$0xff] }
 0x20a   : > { %v1025_v61 = vpop.eup %1024 }
 0x20b   : > { %v789_v62 = vmul.f32 0.00390625, %v1025_v61 }
 0x20d   : > { %v791_v3 = vperm.slane %v789_v62, 0 }
 0x20f   : > { %v793_v20 = vmul.f32 %v791_v3, %v787_v63  ;;  %v794_v25 = vmul.f32 %v791_v3, %v788_v1 }
 0x211   : > { %795 = vst.msk [vmem:[%s1564_s4] sm:$0xff] %vm284_vm0, %v793_v20 }
 0x212   : > { %796 = vst.msk [vmem:[%s1564_s4 + $0x8] sm:$0xff] %vm284_vm0, %v794_v25 }
 0x213 PF: > { %s829_s10 = sshll.u32 %s1565_s5, 4  ;;  %s1153_s11 = smov [#allocation4]   ;;  %s830_s10 = int_to_ptr.hbm [resolvable:$true] %s829_s10 }
 0x214   : > { %s827_s12 = sshll.u32 %s1153_s11, 4  ;;  %s954_s13 = sshll.u32 %s1214_s25, 3  ;;  %s828_s12 = int_to_ptr.vmem [resolvable:$true] %s827_s12 }
 0x215   : > { %964 = dma.vmem_to_hbm [thread:$0]  (%p112_p2), %s828_s12, 16, %s830_s10, [#allocation5]  }
 0x216   : > { %s809_s15 = sshll.u32 %s1319_s14, 4  ;;  %s808_s18 = scalar_lea.hbm %s1563_s3, %s954_s13  ;;  %s810_s15 = int_to_ptr.vmem [resolvable:$true] %s809_s15 }
 0x217   : > { %s811_s19 = sshll.u32 %s808_s18, 4  ;;  %s798_s20 = scalar_lea.sflag [#allocation3], %s243_s9  ;;  %s812_s19 = int_to_ptr.hbm [resolvable:$true] %s811_s19 }
 0x218   : > { %s1068_s26 = sshra.s32 %s812_s19, 4  ;;  %s1074_s14 = scalar_lea.hbm %s1563_s3, 32  ;;  %s1069_s26 = int_to_ptr.hbm [resolvable:$true] %s1068_s26 }
 0x219   : > { %s1070_s28 = scalar_lea.hbm %s1069_s26, 16  ;;  %p1075_p4 = scmp.lt.s32.totalorder %s1069_s26, %s1563_s3 }
 0x21a   : > { %p1071_p0 = scmp.ne.s32.totalorder %s1069_s26, %s1070_s28  ;;  %p1076_p7 = scmp.lt.s32.totalorder %s1074_s14, %s1070_s28 }
 0x21c   : > { %p1072_p1 = pnand %p1071_p0, %p1233_p5  ;;  %p1077_p8 = por %p1076_p7, %p1075_p4 }
 0x21e   : > { %p1073_p3 = pneg %p1072_p1 }
 0x220   : > { %p1078_p9 = pnand %p1077_p8, %p1073_p3 }
 0x222   : > { %1081 = shalt.err (!%p1078_p9)
}
 0x223   : > { %s1154_s9 = smov 128   ;;  %s1155_s13 = smov 256  }
 0x224   : > { %s1156_s16 = smov 8   ;;  %s1157_s17 = smov [#allocation6]  }
 0x225   : > { %962 = dma.vmem_to_hbm [thread:$0]  (%p1233_p5), %s810_s15, 256, %s812_s19, %s798_s20, %s1154_s9, %s1155_s13, %s1156_s16  }
 0x226   : > { %s839_s18 = sshll.u32 %s1157_s17, 4  ;;  %s841_s0 = sshll.u32 %s1566_s6, 4  ;;  %s840_s18 = int_to_ptr.vmem [resolvable:$true] %s839_s18  ;;  %s842_s0 = int_to_ptr.hbm [resolvable:$true] %s841_s0 }
 0x227   : > { %966 = dma.vmem_to_hbm [thread:$0]  (%p112_p2), %s840_s18, 16, %s842_s0, [#allocation5]  }
 0x228   : > { %1127 = dma.done.wait (%p112_p2), [#allocation5], 32  }
 0x229   : > { %1129 = vsyncadd (%p112_p2), [#allocation5], 4294967264 }
 0x22a PF: > { %p980_p5 = scmp.ge.s32.totalorder %s1148_s24, 2  ;;  %s866_s7 = sand.u32 1, %s1136_s21  }
 0x22b   : > { %s867_s15 = scalar_lea.sflag [#allocation3], %s866_s7 }
 0x22c   : > { %p973_p10 = pnand %p980_p5, %p1237_p6 }
 0x22e   : > { %p974_p11 = pneg %p973_p10 }
 0x230   : > { %1131 = dma.done.wait (%p974_p11), %s867_s15, 256  }
 0x231   : > { %1133 = vsyncadd (%p974_p11), %s867_s15, 4294967040  ;;  %p18_p12 = scmp.ge.s32.totalorder %s1218_s27, 4   ;;  %s1571_s21 = smov %s1140_s22 }
 0x232   : > { %s1572_s22 = smov %s1144_s23  ;;  %s1573_s23 = smov %s1229_s30 }
 0x233   : > { %s1574_s24 = smov %s1218_s27  ;;  %20 = sbr.rel (!%p18_p12) target bundleno = 6 (0x6), region = 103 }
 0x238   :  { %873 = vsyncpa [#allocation3], 1 }
 0x239   :  { %875 = vsyncpa [#allocation3 + $0x1], 1 }
 0x23a   :  { %876 = vsyncpa [#allocation5], 1 }

</bundles_post_ra>
